<compile_context>
chip_gen: v6e
topology: v6e:2x2x1
jax: 0.10.0
libtpu: 0.0.40
codegen_flags: <defaults>
</compile_context>

<pallas_src>
import functools

import jax
import jax.numpy as jnp
from jax.experimental import pallas as pl
from jax.experimental.pallas import tpu as pltpu

# Scaled-down, lane-friendly dims (real module: EMBED_DIM_Res = 2048,
# TRANSFORMER_EMBED = 768 — both multiples of 128, as are these stand-ins).
EMBED_DIM = 256    # stands in for EMBED_DIM_Res
TXT_EMBED = 128    # stands in for TRANSFORMER_EMBED
VOCAB     = 100
LN_EPS    = 1e-5   # nn.LayerNorm default eps
NORM_EPS  = 1e-12  # F.normalize default eps
OUT_LANES = 128    # lane-padded scalar-output slab


def _vmem():
    return pl.BlockSpec(memory_space=pltpu.MemorySpace.VMEM)


def _largest_tile(dim, cap, align=128):
    """Largest multiple of `align` dividing `dim` that is <= cap (dim is an
    align multiple by construction)."""
    t = min(dim, cap)
    t -= t % align
    while t > align and dim % t:
        t -= align
    return max(t, align)


# ----------------------------------------------------------------------------
# Kernel 1: tiled matmul (frozen vision-backbone stand-in: flat pixels -> feat)
#   bf16 MXU inputs, f32 accumulation in a VMEM scratch, K innermost
#   "arbitrary" reduction axis, N "parallel" (megacore shard on v7x).
#   Small-batch specialization: tm = M (no M grid axis), bf16 output.
# ----------------------------------------------------------------------------
def _matmul_kernel(x_ref, w_ref, o_ref, acc_ref, *, k_axis):
    @pl.when(pl.program_id(k_axis) == 0)
    def _():
        acc_ref[...] = jnp.zeros_like(acc_ref)

    acc_ref[...] += jnp.dot(x_ref[...], w_ref[...],
                            preferred_element_type=jnp.float32)

    @pl.when(pl.program_id(k_axis) == pl.num_programs(k_axis) - 1)
    def _():
        o_ref[...] = acc_ref[...].astype(o_ref.dtype)


def matmul_tiled(x, w, *, tn=512, tk=2048):
    """x: (M, K) bf16, w: (K, N) bf16 -> (M, N) bf16.

    Weight tiles are sized so each grid step moves >= ~0.5 MiB at real dims
    (tk*tn bf16), keeping the pipeline bandwidth-bound rather than
    step-overhead bound.  Small-batch path only (M <= 512): the LHS rows live
    fully in VMEM and the M grid axis is dropped.
    """
    M, K = x.shape
    K2, N = w.shape
    assert K == K2
    assert M <= 512 and M % 8 == 0, "small-batch path (batch padded to 16)"
    assert K % 128 == 0 and N % 128 == 0
    tm = M
    tn = _largest_tile(N, tn, 128)
    tk = _largest_tile(K, tk, 128)
    grid = (N // tn, K // tk)

    # Explicit VMEM budget (critical on v7x's 64 MiB physical / 32 MiB scoped
    # default): double-buffered bf16 input tiles + f32 accumulator +
    # double-buffered bf16 output tile + headroom.
    need = (2 * 2 * (tm * tk + tk * tn) + 4 * tm * tn + 2 * 2 * tm * tn
            + (4 << 20))
    vmem_bytes = int(min(max(need, 32 << 20), 96 << 20))

    return pl.pallas_call(
        functools.partial(_matmul_kernel, k_axis=1),
        out_shape=jax.ShapeDtypeStruct((M, N), jnp.bfloat16),
        grid_spec=pltpu.PrefetchScalarGridSpec(
            num_scalar_prefetch=0,
            grid=grid,
            in_specs=[pl.BlockSpec((tm, tk), lambda j, k: (0, k)),
                      pl.BlockSpec((tk, tn), lambda j, k: (k, j))],
            out_specs=pl.BlockSpec((tm, tn), lambda j, k: (0, j)),
            scratch_shapes=[pltpu.VMEM((tm, tn), jnp.float32)]),
        compiler_params=pltpu.CompilerParams(
            dimension_semantics=("parallel", "arbitrary"),
            vmem_limit_bytes=vmem_bytes),
    )(x, w)


# ----------------------------------------------------------------------------
# Kernel 2: fused ALIGN head.
#   caption path: e1 = cls @ W1 ; e2 = drop(gelu(e1) @ W2) ;
#                 ln = LayerNorm(e1 + e2) ; cap = ln / ||ln||
#   image path:   img = F.normalize(img_feat, p=2, dim=-1)
#   sim = cap @ img.T  (single bf16 MXU contraction; sim.T via XLU transpose)
#   CLIP loss (symmetric CE) and both argmax retrieval metrics.
#   Padded batch rows (>= `batch`) are masked out of loss and metrics.
#   All three scalars packed into one lane-padded (1, OUT_LANES) output.
# ----------------------------------------------------------------------------
def _head_kernel(cls_ref, w1_ref, w2_ref, g_ref, b_ref, imgf_ref, out_ref,
                 *, batch):
    # ---- Projection head (bf16 MXU inputs, f32 elementwise math) ----
    e1 = jnp.dot(cls_ref[...], w1_ref[...],
                 preferred_element_type=jnp.float32)
    # TODO(synk): PyTorch F.gelu default is the exact erf form; tanh
    # approximation used here for reliable Mosaic lowering (EUP tanh).
    g = jax.nn.gelu(e1, approximate=True)
    e2 = jnp.dot(g.astype(jnp.bfloat16), w2_ref[...],
                 preferred_element_type=jnp.float32)
    # TODO(synk): nn.Dropout(p=0.5) treated as identity (eval-mode semantics).
    h = e1 + e2
    mu = jnp.mean(h, axis=-1, keepdims=True)
    d = h - mu
    var = jnp.mean(d * d, axis=-1, keepdims=True)
    ln = d * jax.lax.rsqrt(var + LN_EPS) * g_ref[...] + b_ref[...]

    # projected_vec / torch.norm(projected_vec, dim=-1, keepdim=True)
    cap = ln * jax.lax.rsqrt(jnp.sum(ln * ln, axis=-1, keepdims=True))
    # TODO(synk): the subsequent F.normalize(caption_embed) in forward() is a
    # numerical no-op on an already unit-norm vector and is folded away.

    # image_embed = F.normalize(image_embed)  (x / max(||x||, eps))
    imgf = imgf_ref[...].astype(jnp.float32)
    ssq = jnp.sum(imgf * imgf, axis=-1, keepdims=True)
    img = imgf * jax.lax.rsqrt(jnp.maximum(ssq, NORM_EPS * NORM_EPS))

    # ---- similarity: ONE bf16 MXU contraction; transpose comes from XLU ----
    dn = (((1,), (1,)), ((), ()))            # contract the feature dim of both
    sim = jax.lax.dot_general(cap.astype(jnp.bfloat16),
                              img.astype(jnp.bfloat16), dn,
                              preferred_element_type=jnp.float32)  # rows = cap
    sim_t = jnp.transpose(sim)                                     # rows = img

    Bp = sim.shape[0]
    col_ids = jax.lax.broadcasted_iota(jnp.int32, (Bp, Bp), 1)
    row_ids = jax.lax.broadcasted_iota(jnp.int32, (Bp, Bp), 0)
    row_idx = jax.lax.broadcasted_iota(jnp.int32, (Bp, 1), 0)
    col_valid = col_ids < batch                                    # (Bp, Bp)
    row_valid = (row_idx < batch).astype(jnp.float32)              # (Bp, 1)
    neg = jnp.float32(-1e30)

    # diagonal taken from the actual (bf16-accumulated) sim values so the
    # cross-entropy numerator/denominator stay consistent.
    diag = jnp.sum(jnp.where(col_ids == row_ids, sim, 0.0),
                   axis=1, keepdims=True)                          # (Bp, 1)

    def masked_row_lse(mat):
        m = jnp.where(col_valid, mat, neg)
        mx = jnp.max(m, axis=1, keepdims=True)
        lse = mx + jnp.log(jnp.sum(jnp.exp(m - mx), axis=1, keepdims=True))
        return m, mx, lse

    sm, smax, lse_row = masked_row_lse(sim)      # loss_t: softmax over dim=1
    stm, stmax, lse_col = masked_row_lse(sim_t)  # loss_i: softmax over dim=0

    inv_b = jnp.float32(1.0 / batch)
    loss_t = jnp.sum(row_valid * (lse_row - diag), axis=0, keepdims=True) * inv_b
    loss_i = jnp.sum(row_valid * (lse_col - diag), axis=0, keepdims=True) * inv_b
    loss = 0.5 * (loss_i + loss_t)                                 # (1, 1)

    # argmax with first-index tie-break (matches torch.argmax behavior)
    am_row = jnp.min(jnp.where(sm == smax, col_ids, Bp), axis=1, keepdims=True)
    am_col = jnp.min(jnp.where(stm == stmax, col_ids, Bp), axis=1, keepdims=True)
    img_acc = jnp.sum(row_valid * (am_row == row_idx).astype(jnp.float32),
                      axis=0, keepdims=True) * inv_b               # (1, 1)
    cap_acc = jnp.sum(row_valid * (am_col == row_idx).astype(jnp.float32),
                      axis=0, keepdims=True) * inv_b               # (1, 1)

    # pack the three scalars into one lane-padded output slab
    lane = jax.lax.broadcasted_iota(jnp.int32, (1, OUT_LANES), 1)
    out_ref[...] = jnp.where(lane == 0, loss,
                   jnp.where(lane == 1, img_acc,
                   jnp.where(lane == 2, cap_acc, jnp.float32(0.0))))


def fused_head(cls, w1, w2, gamma, beta, img_feat, *, batch):
    Bp, E = img_feat.shape
    # Explicit VMEM budget so production-sized batches compile on v7x (64 MiB).
    inputs_bytes = sum(int(a.size) * a.dtype.itemsize
                       for a in (cls, w1, w2, gamma, beta, img_feat))
    interm_bytes = Bp * E * 4 * 8 + Bp * Bp * 4 * 4
    vmem_bytes = int(min(max(2 * inputs_bytes + interm_bytes + (4 << 20),
                             32 << 20), 96 << 20))
    out = pl.pallas_call(
        functools.partial(_head_kernel, batch=batch),
        out_shape=jax.ShapeDtypeStruct((1, OUT_LANES), jnp.float32),
        in_specs=[_vmem()] * 6,
        out_specs=_vmem(),
        compiler_params=pltpu.CompilerParams(vmem_limit_bytes=vmem_bytes),
    )(cls, w1, w2, gamma, beta, img_feat)
    return out[0, 0], out[0, 1], out[0, 2]


# ----------------------------------------------------------------------------
# Parameter init (deterministic, synthetic)
# ----------------------------------------------------------------------------
def init_params(key, img_feat_dim):
    k = jax.random.split(key, 4)
    return dict(
        # frozen vision-backbone stand-in: flattened pixels -> EMBED_DIM (bf16
        # weights: frozen, MXU-friendly, halves DMA volume)
        w_vis=(jax.random.normal(k[0], (img_feat_dim, EMBED_DIM), jnp.float32)
               * 0.02).astype(jnp.bfloat16),
        # frozen text-backbone stand-in: token embedding table (CLS lookup),
        # stored bf16 so cls arrives MXU-ready (no in-kernel cast, half DMA).
        tok_emb=(jax.random.normal(k[1], (VOCAB, TXT_EMBED), jnp.float32)
                 * 0.02).astype(jnp.bfloat16),
        # Projection head (the trainable part of the PyTorch module)
        w1=(jax.random.normal(k[2], (TXT_EMBED, EMBED_DIM), jnp.float32)
            / jnp.sqrt(float(TXT_EMBED))).astype(jnp.bfloat16),
        w2=(jax.random.normal(k[3], (EMBED_DIM, EMBED_DIM), jnp.float32)
            / jnp.sqrt(float(EMBED_DIM))).astype(jnp.bfloat16),
        gamma=jnp.ones((1, EMBED_DIM), jnp.float32),   # LayerNorm weight
        beta=jnp.zeros((1, EMBED_DIM), jnp.float32),   # LayerNorm bias
    )


# ----------------------------------------------------------------------------
# CustomModelResBERT.forward
# ----------------------------------------------------------------------------
def custom_model_res_bert_forward(params, images, input_ids, attention_mask):
    B = images.shape[0]
    # pad batch to a bf16-packing-friendly multiple of 16; padded rows are
    # masked out of the loss/metrics inside the fused head kernel.
    Bp = max(16, ((B + 15) // 16) * 16)
    pad = Bp - B
    images_p = jnp.pad(images, ((0, pad), (0, 0), (0, 0), (0, 0)))
    ids_p = jnp.pad(input_ids, ((0, pad), (0, 0)))      # padded rows -> token 0

    # ---- VisionEncoderRes ----
    # TODO(synk): frozen pretrained ResNet50 backbone replaced by a frozen
    # linear stand-in (flatten NCHW -> EMBED_DIM features), tiled bf16 matmul.
    x_flat = images_p.reshape(Bp, -1).astype(jnp.bfloat16)
    img_feat = matmul_tiled(x_flat, params["w_vis"])     # (Bp, EMBED) bf16

    # ---- TextEncoderBERT ----
    # TODO(synk): frozen pretrained DistilBERT base + tokenizer replaced by a
    # frozen CLS-token embedding lookup; attention_mask unused by the stand-in.
    cls = params["tok_emb"][ids_p[:, 0]]                 # (Bp, TXT_EMBED) bf16

    # ---- Projection + normalize + similarity + CLIP loss + metrics, fused ----
    loss, img_acc, cap_acc = fused_head(
        cls, params["w1"], params["w2"], params["gamma"], params["beta"],
        img_feat, batch=B)
    return loss, img_acc, cap_acc


if __name__ == "__main__":
    key = jax.random.PRNGKey(0)
    pkey, ikey, tkey = jax.random.split(key, 3)

    B, C, H, W = 2, 4, 16, 16
    S = 8
    params = init_params(pkey, C * H * W)

    images = jax.random.normal(ikey, (B, C, H, W), jnp.float32)
    input_ids = jax.random.randint(tkey, (B, S), 0, VOCAB, dtype=jnp.int32)
    attention_mask = jnp.ones((B, S), jnp.int32)

    loss, img_acc, cap_acc = custom_model_res_bert_forward(
        params, images, input_ids, attention_mask)
    jax.block_until_ready((loss, img_acc, cap_acc))
    print("KERNEL_OK")
</pallas_src>

<mosaic_0001>
module attributes {stable_mosaic.version = 11 : i64} {
  func.func @_matmul_kernel(%arg0: i32, %arg1: i32, %arg2: memref<16x1024xbf16, #tpu.memory_space<vmem>>, %arg3: memref<1024x256xbf16, #tpu.memory_space<vmem>>, %arg4: memref<16x256xbf16, #tpu.memory_space<vmem>>, %arg5: memref<16x256xf32, #tpu.memory_space<vmem>>) attributes {dimension_semantics = [#tpu.dimension_semantics<parallel>, #tpu.dimension_semantics<arbitrary>], iteration_bounds = array<i64: 1, 1>, scalar_prefetch = 0 : i64, scratch_operands = 1 : i64, tpu.core_type = #tpu.core_type<tc>, window_params = [{transform_indices = @transform_0, window_bounds = array<i64: 16, 1024>}, {transform_indices = @transform_1, window_bounds = array<i64: 1024, 256>}, {transform_indices = @transform_2, window_bounds = array<i64: 16, 256>}]} {
    %c0_i32 = arith.constant 0 : i32
    %0 = arith.cmpi eq, %arg1, %c0_i32 : i32
    %1 = arith.extui %0 : i1 to i32
    %c0_i32_0 = arith.constant 0 : i32
    %2 = arith.cmpi ne, %1, %c0_i32_0 : i32
    scf.if %2 {
      %cst_10 = arith.constant 0.000000e+00 : f32
      %12 = vector.broadcast %cst_10 : f32 to vector<16x256xf32>
      %c0_11 = arith.constant 0 : index
      %c0_12 = arith.constant 0 : index
      %13 = vector.load %arg5[%c0_11, %c0_12] : memref<16x256xf32, #tpu.memory_space<vmem>>, vector<16x256xf32>
      tpu.vector_store %arg5[%c0_11, %c0_12], %12 {strides = array<i32>} : memref<16x256xf32, #tpu.memory_space<vmem>>, vector<16x256xf32>,
    } else {
    }
    %c0 = arith.constant 0 : index
    %c0_1 = arith.constant 0 : index
    %3 = vector.load %arg5[%c0, %c0_1] : memref<16x256xf32, #tpu.memory_space<vmem>>, vector<16x256xf32>
    %c0_2 = arith.constant 0 : index
    %c0_3 = arith.constant 0 : index
    %4 = vector.load %arg2[%c0_2, %c0_3] : memref<16x1024xbf16, #tpu.memory_space<vmem>>, vector<16x1024xbf16>
    %c0_4 = arith.constant 0 : index
    %c0_5 = arith.constant 0 : index
    %5 = vector.load %arg3[%c0_4, %c0_5] : memref<1024x256xbf16, #tpu.memory_space<vmem>>, vector<1024x256xbf16>
    %cst = arith.constant dense<0.000000e+00> : vector<16x256xf32>
    %6 = tpu.matmul %4, %5, %cst {dimension_numbers = #tpu.dot_dimension_numbers<[1], [0], [0], [1], [0, 0, 1, 1], [], []>} : vector<16x1024xbf16>, vector<1024x256xbf16>, vector<16x256xf32> -> vector<16x256xf32>
    %7 = arith.addf %3, %6 : vector<16x256xf32>
    %c0_6 = arith.constant 0 : index
    %c0_7 = arith.constant 0 : index
    %8 = vector.load %arg5[%c0_6, %c0_7] : memref<16x256xf32, #tpu.memory_space<vmem>>, vector<16x256xf32>
    tpu.vector_store %arg5[%c0_6, %c0_7], %7 {strides = array<i32>} : memref<16x256xf32, #tpu.memory_space<vmem>>, vector<16x256xf32>,
    %c0_i32_8 = arith.constant 0 : i32
    %9 = arith.cmpi eq, %arg1, %c0_i32_8 : i32
    %10 = arith.extui %9 : i1 to i32
    %c0_i32_9 = arith.constant 0 : i32
    %11 = arith.cmpi ne, %10, %c0_i32_9 : i32
    scf.if %11 {
      %c0_10 = arith.constant 0 : index
      %c0_11 = arith.constant 0 : index
      %12 = vector.load %arg5[%c0_10, %c0_11] : memref<16x256xf32, #tpu.memory_space<vmem>>, vector<16x256xf32>
      %13 = arith.truncf %12 : vector<16x256xf32> to vector<16x256xbf16>
      %c0_12 = arith.constant 0 : index
      %c0_13 = arith.constant 0 : index
      %14 = vector.load %arg4[%c0_12, %c0_13] : memref<16x256xbf16, #tpu.memory_space<vmem>>, vector<16x256xbf16>
      tpu.vector_store %arg4[%c0_12, %c0_13], %13 {strides = array<i32>} : memref<16x256xbf16, #tpu.memory_space<vmem>>, vector<16x256xbf16>,
    } else {
    }
    return
  }
  func.func @transform_0(%arg0: i32, %arg1: i32) -> (i32, i32) {
    %c0_i32 = arith.constant 0 : i32
    %c0_i32_0 = arith.constant 0 : i32
    return %c0_i32, %arg1 : i32, i32
  }
  func.func @transform_1(%arg0: i32, %arg1: i32) -> (i32, i32) {
    %c0_i32 = arith.constant 0 : i32
    return %arg1, %arg0 : i32, i32
  }
  func.func @transform_2(%arg0: i32, %arg1: i32) -> (i32, i32) {
    %c0_i32 = arith.constant 0 : i32
    %c0_i32_0 = arith.constant 0 : i32
    return %c0_i32, %arg0 : i32, i32
  }
}

</mosaic_0001>

<bundles_post_ra>
// kernel: tpu_custom_call.1
= control target key start
LH: loop header
LB: loop body
LE: loop exit
PB: predicated region body
PF: predicated region fallthrough
CT: control target
= control target key end

     0   :  { %7 = vsyncpa [#allocation4], 0  ;;  %s1545_s0 = inlined_call_operand.hbm [shape: bf16[16,1024], index: 0, kind: input, shape index: {}]   ;;  %s1546_s1 = inlined_call_operand.hbm [shape: bf16[1024,256], index: 1, kind: input, shape index: {}]   ;;  %s1547_s2 = inlined_call_operand.hbm [shape: bf16[16,256], index: 2, kind: output, shape index: {}]  }
   0x1   :  { %8 = vsyncpa [#allocation7], 0 }
   0x2   :  { %9 = vsyncpa [#allocation5], 0  ;;  %s1492_s9 = smov [#allocation3]  }
   0x3   :  { %s15_s10 = sshll.u32 %s1492_s9, 4  ;;  %s16_s10 = int_to_ptr.vmem [resolvable:$true] %s15_s10 }
   0x4   :  { %s1434_s11 = scalar_lea.vmem %s16_s10, 1024  ;;  %p1439_p1 = scmp.lt.s32.totalorder %s16_s10, %s16_s10 }
   0x5   :  { %p1435_p0 = scmp.ne.s32.totalorder %s16_s10, %s1434_s11  ;;  %p1440_p2 = scmp.lt.s32.totalorder %s1434_s11, %s1434_s11 }
   0x7   :  { %p1441_p3 = por %p1440_p2, %p1439_p1 }
   0x9   :  { %p1442_p4 = pnand %p1441_p3, %p1435_p0 }
   0xb   :  { %1445 = shalt.err (!%p1442_p4)
}
   0xc   :  { %s1493_s12 = smov 512   ;;  %s1494_s13 = smov 32  }
   0xd   :  { %21 = dma.hbm_to_vmem [thread:$0]  %s1545_s0, 1024, %s16_s10, [#allocation4], %s1493_s12, %s1493_s12, %s1494_s13  }
   0xe   :  { %s1495_s16 = smov [#allocation6]  }
   0xf   :  { %s27_s17 = sshll.u32 %s1495_s16, 4  ;;  %s28_s17 = int_to_ptr.vmem [resolvable:$true] %s27_s17 }
  0x10   :  { %s1454_s18 = scalar_lea.vmem %s28_s17, 16384  ;;  %p1459_p6 = scmp.lt.s32.totalorder %s28_s17, %s28_s17 }
  0x11   :  { %p1455_p5 = scmp.ne.s32.totalorder %s28_s17, %s1454_s18  ;;  %p1460_p7 = scmp.lt.s32.totalorder %s1454_s18, %s1454_s18 }
  0x13   :  { %p1461_p8 = por %p1460_p7, %p1459_p6 }
  0x15   :  { %p1462_p9 = pnand %p1461_p8, %p1455_p5 }
  0x17   :  { %1465 = shalt.err (!%p1462_p9)
}
  0x18   :  { %s1496_s19 = smov 128   ;;  %s1497_s20 = smov 8  }
  0x19   :  { %33 = dma.hbm_to_vmem [thread:$0]  %s1546_s1, 16384, %s28_s17, [#allocation7], %s1496_s19, %s1496_s19, %s1497_s20  }
  0x1a   :  { %1486 = dma.done.wait [#allocation4], 1024  }
  0x1b   :  { %1487 = vsyncadd [#allocation4], 4294966272 }
  0x1c   :  { %1488 = dma.done.wait [#allocation7], 16384  }
  0x1d   :  { %1489 = vsyncadd [#allocation7], 4294950912  ;;  %v1234_v0 = vld [vmem:[#allocation6 + $0x74] ss:$8 sps:$4 sm:$0xff]   ;;  %v1238_v2 = vld [vmem:[#allocation6 + $0x70] ss:$8 sps:$4 sm:$0xff]  }
  0x1e   :  { %v1236_v1 = vld [vmem:[#allocation6 + $0x174] ss:$8 sps:$4 sm:$0xff]   ;;  %868 = vmatprep.subr.bf16.mxu0 %v1234_v0  ;;  %v1239_v3 = vld [vmem:[#allocation6 + $0x170] ss:$8 sps:$4 sm:$0xff]   ;;  %v1240_v4 = vld [vmem:[#allocation6 + $0x64] ss:$8 sps:$4 sm:$0xff]  }
  0x1f   :  { %911 = vmatprep.subr.bf16.mxu1 %v1236_v1  ;;  %869 = vmatpush1.bf16.msra.mxu0 %v1238_v2  ;;  %v1242_v5 = vld [vmem:[#allocation6 + $0x164] ss:$8 sps:$4 sm:$0xff]   ;;  %v1244_v6 = vld [vmem:[#allocation6 + $0x60] ss:$8 sps:$4 sm:$0xff]   ;;  %v1246_v8 = vld [vmem:[#allocation6 + $0x54] ss:$8 sps:$4 sm:$0xff]  }
  0x20   :  { %912 = vmatpush1.bf16.msra.mxu1 %v1239_v3  ;;  %870 = vmatprep.subr.bf16.mxu0 %v1240_v4  ;;  %v1245_v7 = vld [vmem:[#allocation6 + $0x160] ss:$8 sps:$4 sm:$0xff]   ;;  %v1248_v9 = vld [vmem:[#allocation6 + $0x154] ss:$8 sps:$4 sm:$0xff]   ;;  %v1250_v10 = vld [vmem:[#allocation6 + $0x50] ss:$8 sps:$4 sm:$0xff]  }
  0x21   :  { %913 = vmatprep.subr.bf16.mxu1 %v1242_v5  ;;  %v1251_v11 = vld [vmem:[#allocation6 + $0x150] ss:$8 sps:$4 sm:$0xff]   ;;  %v1252_v12 = vld [vmem:[#allocation6 + $0x44] ss:$8 sps:$4 sm:$0xff]   ;;  %v1256_v14 = vld [vmem:[#allocation6 + $0x40] ss:$8 sps:$4 sm:$0xff]  }
  0x22   :  { %v1254_v13 = vld [vmem:[#allocation6 + $0x144] ss:$8 sps:$4 sm:$0xff]   ;;  %v1257_v15 = vld [vmem:[#allocation6 + $0x140] ss:$8 sps:$4 sm:$0xff]   ;;  %v1258_v16 = vld [vmem:[#allocation6 + $0x34] ss:$8 sps:$4 sm:$0xff]  }
  0x23   :  { %871 = vmatpush1.bf16.msra.mxu0 %v1244_v6  ;;  %v1260_v17 = vld [vmem:[#allocation6 + $0x134] ss:$8 sps:$4 sm:$0xff]   ;;  %v1262_v18 = vld [vmem:[#allocation6 + $0x30] ss:$8 sps:$4 sm:$0xff]   ;;  %v1264_v20 = vld [vmem:[#allocation6 + $0x24] ss:$8 sps:$4 sm:$0xff]  }
  0x24   :  { %914 = vmatpush1.bf16.msra.mxu1 %v1245_v7  ;;  %872 = vmatprep.subr.bf16.mxu0 %v1246_v8  ;;  %v1263_v19 = vld [vmem:[#allocation6 + $0x130] ss:$8 sps:$4 sm:$0xff]   ;;  %v1266_v21 = vld [vmem:[#allocation6 + $0x124] ss:$8 sps:$4 sm:$0xff]   ;;  %v1268_v22 = vld [vmem:[#allocation6 + $0x20] ss:$8 sps:$4 sm:$0xff]  }
  0x25   :  { %915 = vmatprep.subr.bf16.mxu1 %v1248_v9  ;;  %v1269_v23 = vld [vmem:[#allocation6 + $0x120] ss:$8 sps:$4 sm:$0xff]   ;;  %v1270_v24 = vld [vmem:[#allocation6 + $0x14] ss:$8 sps:$4 sm:$0xff]   ;;  %v1274_v26 = vld [vmem:[#allocation6 + $0x10] ss:$8 sps:$4 sm:$0xff]  }
  0x26   :  { %v1272_v25 = vld [vmem:[#allocation6 + $0x114] ss:$8 sps:$4 sm:$0xff]   ;;  %v1275_v27 = vld [vmem:[#allocation6 + $0x110] ss:$8 sps:$4 sm:$0xff]   ;;  %v1276_v28 = vld [vmem:[#allocation6 + $0x4] ss:$8 sps:$4 sm:$0xff]  }
  0x27   :  { %873 = vmatpush1.bf16.msra.mxu0 %v1250_v10  ;;  %v1278_v29 = vld [vmem:[#allocation6 + $0x104] ss:$8 sps:$4 sm:$0xff]   ;;  %v1280_v30 = vld [vmem:[#allocation6] ss:$8 sps:$4 sm:$0xff]   ;;  %v1282_v32 = vld [vmem:[#allocation6 + $0xf4] ss:$8 sps:$4 sm:$0xff]  }
  0x28   :  { %916 = vmatpush1.bf16.msra.mxu1 %v1251_v11  ;;  %874 = vmatprep.subr.bf16.mxu0 %v1252_v12  ;;  %v1281_v31 = vld [vmem:[#allocation6 + $0x100] ss:$8 sps:$4 sm:$0xff]   ;;  %v1284_v33 = vld [vmem:[#allocation6 + $0x1f4] ss:$8 sps:$4 sm:$0xff]   ;;  %v1286_v34 = vld [vmem:[#allocation6 + $0xf0] ss:$8 sps:$4 sm:$0xff]  }
  0x29   :  { %917 = vmatprep.subr.bf16.mxu1 %v1254_v13  ;;  %v1287_v35 = vld [vmem:[#allocation6 + $0x1f0] ss:$8 sps:$4 sm:$0xff]   ;;  %v1288_v36 = vld [vmem:[#allocation6 + $0xe4] ss:$8 sps:$4 sm:$0xff]   ;;  %v1292_v38 = vld [vmem:[#allocation6 + $0xe0] ss:$8 sps:$4 sm:$0xff]  }
  0x2a   :  { %v1290_v37 = vld [vmem:[#allocation6 + $0x1e4] ss:$8 sps:$4 sm:$0xff]   ;;  %v1293_v39 = vld [vmem:[#allocation6 + $0x1e0] ss:$8 sps:$4 sm:$0xff]   ;;  %v1294_v40 = vld [vmem:[#allocation6 + $0xd4] ss:$8 sps:$4 sm:$0xff]  }
  0x2b   :  { %875 = vmatpush1.bf16.msra.mxu0 %v1256_v14  ;;  %v1296_v41 = vld [vmem:[#allocation6 + $0x1d4] ss:$8 sps:$4 sm:$0xff]   ;;  %v1298_v42 = vld [vmem:[#allocation6 + $0xd0] ss:$8 sps:$4 sm:$0xff]   ;;  %v1300_v44 = vld [vmem:[#allocation6 + $0xc4] ss:$8 sps:$4 sm:$0xff]  }
  0x2c   :  { %918 = vmatpush1.bf16.msra.mxu1 %v1257_v15  ;;  %876 = vmatprep.subr.bf16.mxu0 %v1258_v16  ;;  %v1299_v43 = vld [vmem:[#allocation6 + $0x1d0] ss:$8 sps:$4 sm:$0xff]   ;;  %v1302_v45 = vld [vmem:[#allocation6 + $0x1c4] ss:$8 sps:$4 sm:$0xff]   ;;  %v1304_v46 = vld [vmem:[#allocation6 + $0xc0] ss:$8 sps:$4 sm:$0xff]  }
  0x2d   :  { %919 = vmatprep.subr.bf16.mxu1 %v1260_v17  ;;  %v1305_v47 = vld [vmem:[#allocation6 + $0x1c0] ss:$8 sps:$4 sm:$0xff]   ;;  %v1306_v52 = vld [vmem:[#allocation6 + $0xb4] ss:$8 sps:$4 sm:$0xff]   ;;  %v1310_v56 = vld [vmem:[#allocation6 + $0xb0] ss:$8 sps:$4 sm:$0xff]  }
  0x2e   :  { %v52_v48 = vld [vmem:[#allocation3] sm:$0xff]  ;;  %v53_v50 = vld [vmem:[#allocation3 + $0x8] sm:$0xff]  ;;  %v1308_v54 = vld [vmem:[#allocation6 + $0x1b4] ss:$8 sps:$4 sm:$0xff]   ;;  %s1498_s0 = smov [#allocation8]  }
  0x2f   :  { %877 = vmatpush1.bf16.msra.mxu0 %v1262_v18  ;;  %v56_v49 = vld [vmem:[#allocation3 + $0x20] sm:$0xff]  ;;  %v57_v51 = vld [vmem:[#allocation3 + $0x28] sm:$0xff]  ;;  %v1311_v57 = vld [vmem:[#allocation6 + $0x1b0] ss:$8 sps:$4 sm:$0xff]   ;;  %s1074_s1 = sshll.u32 %s1498_s0, 4  ;;  %s1075_s1 = int_to_ptr.vmem [resolvable:$true] %s1074_s1 }
  0x30   :  { %920 = vmatpush1.bf16.msra.mxu1 %v1263_v19  ;;  %878 = vmatprep.subr.bf16.mxu0 %v1264_v20  ;;  %v1088_v53 = vcombine.high %v52_v48, %v56_v49  ;;  %v1090_v55 = vcombine.high %v53_v50, %v57_v51  ;;  %v1312_v58 = vld [vmem:[#allocation6 + $0xa4] ss:$8 sps:$4 sm:$0xff]   ;;  %v1316_v60 = vld [vmem:[#allocation6 + $0xa0] ss:$8 sps:$4 sm:$0xff]   ;;  %v1318_v62 = vld [vmem:[#allocation6 + $0x94] ss:$8 sps:$4 sm:$0xff]   ;;  %v1087_v8 = vcombine.low %v52_v48, %v56_v49  ;;  %p1471_p11 = scmp.lt.s32.totalorder %s1075_s1, %s1075_s1 }
  0x31   :  { %921 = vmatprep.subr.bf16.mxu1 %v1266_v21  ;;  %v1314_v59 = vld [vmem:[#allocation6 + $0x1a4] ss:$8 sps:$4 sm:$0xff]   ;;  %v1317_v61 = vld [vmem:[#allocation6 + $0x1a0] ss:$8 sps:$4 sm:$0xff]   ;;  %v1320_v63 = vld [vmem:[#allocation6 + $0x194] ss:$8 sps:$4 sm:$0xff]   ;;  %v1089_v9 = vcombine.low %v53_v50, %v57_v51 }
  0x32   :  { %900 = vmatprep.mubr.bf16.mxu0 %v1088_v53  ;;  %943 = vmatprep.mubr.bf16.mxu1 %v1090_v55  ;;  %v1322_v0 = vld [vmem:[#allocation6 + $0x90] ss:$8 sps:$4 sm:$0xff]   ;;  %v1324_v2 = vld [vmem:[#allocation6 + $0x84] ss:$8 sps:$4 sm:$0xff]   ;;  %v1328_v4 = vld [vmem:[#allocation6 + $0x80] ss:$8 sps:$4 sm:$0xff]  }
  0x33   :  { %879 = vmatpush1.bf16.msra.mxu0 %v1268_v22  ;;  %v1323_v1 = vld [vmem:[#allocation6 + $0x190] ss:$8 sps:$4 sm:$0xff]   ;;  %v1326_v3 = vld [vmem:[#allocation6 + $0x184] ss:$8 sps:$4 sm:$0xff]   ;;  %v1329_v5 = vld [vmem:[#allocation6 + $0x180] ss:$8 sps:$4 sm:$0xff]  }
  0x34   :  { %922 = vmatpush1.bf16.msra.mxu1 %v1269_v23  ;;  %880 = vmatprep.subr.bf16.mxu0 %v1270_v24  ;;  %v1332_v6 = vld [vmem:[#allocation6 + $0x274] ss:$8 sps:$4 sm:$0xff]   ;;  %v1330_v10 = vld [vmem:[#allocation6 + $0x270] ss:$8 sps:$4 sm:$0xff]   ;;  %v1338_v12 = vld [vmem:[#allocation6 + $0x264] ss:$8 sps:$4 sm:$0xff]  }
  0x35   :  { %923 = vmatprep.subr.bf16.mxu1 %v1272_v25  ;;  %v1335_v7 = vld [vmem:[#allocation6 + $0x374] ss:$8 sps:$4 sm:$0xff]   ;;  %v1333_v11 = vld [vmem:[#allocation6 + $0x370] ss:$8 sps:$4 sm:$0xff]   ;;  %v1341_v13 = vld [vmem:[#allocation6 + $0x364] ss:$8 sps:$4 sm:$0xff]  }
  0x36   :  { %v1336_v14 = vld [vmem:[#allocation6 + $0x260] ss:$8 sps:$4 sm:$0xff]   ;;  %v1344_v16 = vld [vmem:[#allocation6 + $0x254] ss:$8 sps:$4 sm:$0xff]   ;;  %v1342_v18 = vld [vmem:[#allocation6 + $0x250] ss:$8 sps:$4 sm:$0xff]  }
  0x37   :  { %881 = vmatpush1.bf16.msra.mxu0 %v1274_v26  ;;  %v1339_v15 = vld [vmem:[#allocation6 + $0x360] ss:$8 sps:$4 sm:$0xff]   ;;  %v1347_v17 = vld [vmem:[#allocation6 + $0x354] ss:$8 sps:$4 sm:$0xff]   ;;  %v1345_v19 = vld [vmem:[#allocation6 + $0x350] ss:$8 sps:$4 sm:$0xff]  }
  0x38   :  { %924 = vmatpush1.bf16.msra.mxu1 %v1275_v27  ;;  %882 = vmatprep.subr.bf16.mxu0 %v1276_v28  ;;  %v1350_v20 = vld [vmem:[#allocation6 + $0x244] ss:$8 sps:$4 sm:$0xff]   ;;  %v1348_v22 = vld [vmem:[#allocation6 + $0x240] ss:$8 sps:$4 sm:$0xff]   ;;  %v1356_v24 = vld [vmem:[#allocation6 + $0x234] ss:$8 sps:$4 sm:$0xff]  }
  0x39   :  { %925 = vmatprep.subr.bf16.mxu1 %v1278_v29  ;;  %v1353_v21 = vld [vmem:[#allocation6 + $0x344] ss:$8 sps:$4 sm:$0xff]   ;;  %v1351_v23 = vld [vmem:[#allocation6 + $0x340] ss:$8 sps:$4 sm:$0xff]   ;;  %v1359_v25 = vld [vmem:[#allocation6 + $0x334] ss:$8 sps:$4 sm:$0xff]  }
  0x3a   :  { %v1354_v26 = vld [vmem:[#allocation6 + $0x230] ss:$8 sps:$4 sm:$0xff]   ;;  %v1362_v28 = vld [vmem:[#allocation6 + $0x224] ss:$8 sps:$4 sm:$0xff]   ;;  %v1387_v53 = vld [vmem:[#allocation6 + $0x3e0] ss:$8 sps:$4 sm:$0xff]  }
  0x3b   :  { %883 = vmatpush1.bf16.msra.mxu0 %v1280_v30  ;;  %v1357_v27 = vld [vmem:[#allocation6 + $0x330] ss:$8 sps:$4 sm:$0xff]   ;;  %v1365_v29 = vld [vmem:[#allocation6 + $0x324] ss:$8 sps:$4 sm:$0xff]   ;;  %v1360_v30 = vld [vmem:[#allocation6 + $0x220] ss:$8 sps:$4 sm:$0xff]  }
  0x3c   :  { %926 = vmatpush1.bf16.msra.mxu1 %v1281_v31  ;;  %884 = vmatprep.subr.bf16.mxu0 %v1282_v32  ;;  %v1363_v31 = vld [vmem:[#allocation6 + $0x320] ss:$8 sps:$4 sm:$0xff]   ;;  %v1368_v32 = vld [vmem:[#allocation6 + $0x214] ss:$8 sps:$4 sm:$0xff]   ;;  %v1378_v48 = vld [vmem:[#allocation6 + $0x2f0] ss:$8 sps:$4 sm:$0xff]  }
  0x3d   :  { %927 = vmatprep.subr.bf16.mxu1 %v1284_v33  ;;  %v1371_v33 = vld [vmem:[#allocation6 + $0x314] ss:$8 sps:$4 sm:$0xff]   ;;  %v1381_v49 = vld [vmem:[#allocation6 + $0x3f0] ss:$8 sps:$4 sm:$0xff]   ;;  %v1386_v50 = vld [vmem:[#allocation6 + $0x2e4] ss:$8 sps:$4 sm:$0xff]  }
  0x3e   :  { %v1389_v51 = vld [vmem:[#allocation6 + $0x3e4] ss:$8 sps:$4 sm:$0xff]   ;;  %v1395_v55 = vld [vmem:[#allocation6 + $0x3d4] ss:$8 sps:$4 sm:$0xff]   ;;  %s1466_s23 = scalar_lea.vmem %s1075_s1, 256 }
  0x3f   :  { %885 = vmatpush2.bf16.msra.mxu0 %v1286_v34  ;;  %v1523_v34 = vld [vmem:[#allocation3 + $0x10] sm:$0xff]  ;;  %p1467_p10 = scmp.ne.s32.totalorder %s1075_s1, %s1466_s23  ;;  %p1472_p12 = scmp.lt.s32.totalorder %s1466_s23, %s1466_s23 }
  0x40   :  { %928 = vmatpush2.bf16.msra.mxu1 %v1287_v35  ;;  %886 = vmatprep.subr.bf16.mxu0 %v1288_v36  ;;  %v1525_v35 = vld [vmem:[#allocation3 + $0x30] sm:$0xff]  ;;  %v1527_v36 = vld [vmem:[#allocation3 + $0x18] sm:$0xff] }
  0x41   :  { %929 = vmatprep.subr.bf16.mxu1 %v1290_v37  ;;  %v1529_v37 = vld [vmem:[#allocation3 + $0x38] sm:$0xff]  ;;  %p1473_p13 = por %p1472_p12, %p1471_p11 }
  0x43   :  { %887 = vmatpush2.bf16.msra.mxu0 %v1292_v38  ;;  %v1366_v38 = vld [vmem:[#allocation6 + $0x210] ss:$8 sps:$4 sm:$0xff]   ;;  %p1474_p0 = pnand %p1473_p13, %p1467_p10 }
  0x44   :  { %930 = vmatpush2.bf16.msra.mxu1 %v1293_v39  ;;  %888 = vmatprep.subr.bf16.mxu0 %v1294_v40  ;;  %v1369_v39 = vld [vmem:[#allocation6 + $0x310] ss:$8 sps:$4 sm:$0xff]   ;;  %v1092_v40 = vcombine.high %v1523_v34, %v1525_v35 }
  0x45   :  { %931 = vmatprep.subr.bf16.mxu1 %v1296_v41  ;;  %v1374_v41 = vld [vmem:[#allocation6 + $0x204] ss:$8 sps:$4 sm:$0xff]  }
  0x47   :  { %889 = vmatpush2.bf16.msra.mxu0 %v1298_v42  ;;  %v1377_v42 = vld [vmem:[#allocation6 + $0x304] ss:$8 sps:$4 sm:$0xff]  }
  0x48   :  { %932 = vmatpush2.bf16.msra.mxu1 %v1299_v43  ;;  %890 = vmatprep.subr.bf16.mxu0 %v1300_v44  ;;  %v1094_v43 = vcombine.high %v1527_v36, %v1529_v37  ;;  %v1372_v44 = vld [vmem:[#allocation6 + $0x200] ss:$8 sps:$4 sm:$0xff]  }
  0x49   :  { %933 = vmatprep.subr.bf16.mxu1 %v1302_v45  ;;  %v1375_v45 = vld [vmem:[#allocation6 + $0x300] ss:$8 sps:$4 sm:$0xff]  }
  0x4b   :  { %891 = vmatpush2.bf16.msra.mxu0 %v1304_v46  ;;  %v1380_v46 = vld [vmem:[#allocation6 + $0x2f4] ss:$8 sps:$4 sm:$0xff]  }
  0x4c   :  { %934 = vmatpush2.bf16.msra.mxu1 %v1305_v47  ;;  %892 = vmatprep.subr.bf16.mxu0 %v1306_v52  ;;  %v1383_v47 = vld [vmem:[#allocation6 + $0x3f4] ss:$8 sps:$4 sm:$0xff]   ;;  %v1384_v52 = vld [vmem:[#allocation6 + $0x2e0] ss:$8 sps:$4 sm:$0xff]  }
  0x4d   :  { %935 = vmatprep.subr.bf16.mxu1 %v1308_v54  ;;  %v1392_v54 = vld [vmem:[#allocation6 + $0x2d4] ss:$8 sps:$4 sm:$0xff]  }
  0x4f   :  { %893 = vmatpush2.bf16.msra.mxu0 %v1310_v56  ;;  %v1390_v56 = vld [vmem:[#allocation6 + $0x2d0] ss:$8 sps:$4 sm:$0xff]  }
  0x50   :  { %936 = vmatpush2.bf16.msra.mxu1 %v1311_v57  ;;  %894 = vmatprep.subr.bf16.mxu0 %v1312_v58  ;;  %v1393_v57 = vld [vmem:[#allocation6 + $0x3d0] ss:$8 sps:$4 sm:$0xff]   ;;  %v1398_v58 = vld [vmem:[#allocation6 + $0x2c4] ss:$8 sps:$4 sm:$0xff]  }
  0x51   :  { %937 = vmatprep.subr.bf16.mxu1 %v1314_v59  ;;  %v1401_v59 = vld [vmem:[#allocation6 + $0x3c4] ss:$8 sps:$4 sm:$0xff]  }
  0x53   :  { %895 = vmatpush2.bf16.msra.mxu0 %v1316_v60  ;;  %v1396_v60 = vld [vmem:[#allocation6 + $0x2c0] ss:$8 sps:$4 sm:$0xff]  }
  0x54   :  { %938 = vmatpush2.bf16.msra.mxu1 %v1317_v61  ;;  %896 = vmatprep.subr.bf16.mxu0 %v1318_v62  ;;  %v1399_v61 = vld [vmem:[#allocation6 + $0x3c0] ss:$8 sps:$4 sm:$0xff]   ;;  %v1404_v62 = vld [vmem:[#allocation6 + $0x2b4] ss:$8 sps:$4 sm:$0xff]  }
  0x55   :  { %939 = vmatprep.subr.bf16.mxu1 %v1320_v63  ;;  %v1407_v63 = vld [vmem:[#allocation6 + $0x3b4] ss:$8 sps:$4 sm:$0xff]  }
  0x57   :  { %897 = vmatpush2.bf16.msra.mxu0 %v1322_v0  ;;  %v1402_v0 = vld [vmem:[#allocation6 + $0x2b0] ss:$8 sps:$4 sm:$0xff]  }
  0x58   :  { %940 = vmatpush2.bf16.msra.mxu1 %v1323_v1  ;;  %898 = vmatprep.subr.bf16.mxu0 %v1324_v2  ;;  %v1405_v1 = vld [vmem:[#allocation6 + $0x3b0] ss:$8 sps:$4 sm:$0xff]   ;;  %v1410_v2 = vld [vmem:[#allocation6 + $0x2a4] ss:$8 sps:$4 sm:$0xff]  }
  0x59   :  { %941 = vmatprep.subr.bf16.mxu1 %v1326_v3  ;;  %v1413_v3 = vld [vmem:[#allocation6 + $0x3a4] ss:$8 sps:$4 sm:$0xff]  }
  0x5b   :  { %899 = vmatpush2.bf16.msra.mxu0 %v1328_v4  ;;  %v1408_v4 = vld [vmem:[#allocation6 + $0x2a0] ss:$8 sps:$4 sm:$0xff]  }
  0x5c   :  { %942 = vmatpush2.bf16.msra.mxu1 %v1329_v5  ;;  %954 = vmatprep.subr.bf16.mxu0 %v1332_v6  ;;  %v1411_v5 = vld [vmem:[#allocation6 + $0x3a0] ss:$8 sps:$4 sm:$0xff]   ;;  %v1416_v6 = vld [vmem:[#allocation6 + $0x294] ss:$8 sps:$4 sm:$0xff]  }
  0x5d   :  { %997 = vmatprep.subr.bf16.mxu1 %v1335_v7  ;;  %v1419_v7 = vld [vmem:[#allocation6 + $0x394] ss:$8 sps:$4 sm:$0xff]  }
  0x5e   :  { %901 = vmatmul.mubr.bf16.vlgmr.msra.gmra.mxu0 %v1087_v8  ;;  %v1414_v8 = vld [vmem:[#allocation6 + $0x290] ss:$8 sps:$4 sm:$0xff]  }
  0x5f   :  { %944 = vmatmul.mubr.bf16.vlgmr.msra.gmra.mxu1 %v1089_v9  ;;  %955 = vmatpush1.bf16.msra.mxu0 %v1330_v10  ;;  %v1417_v9 = vld [vmem:[#allocation6 + $0x390] ss:$8 sps:$4 sm:$0xff]   ;;  %v1422_v10 = vld [vmem:[#allocation6 + $0x284] ss:$8 sps:$4 sm:$0xff]  }
  0x60   :  { %998 = vmatpush1.bf16.msra.mxu1 %v1333_v11  ;;  %956 = vmatprep.subr.bf16.mxu0 %v1338_v12  ;;  %v1425_v11 = vld [vmem:[#allocation6 + $0x384] ss:$8 sps:$4 sm:$0xff]   ;;  %v1420_v12 = vld [vmem:[#allocation6 + $0x280] ss:$8 sps:$4 sm:$0xff]  }
  0x61   :  { %999 = vmatprep.subr.bf16.mxu1 %v1341_v13  ;;  %986 = vmatprep.mubr.bf16.mxu0 %v1092_v40  ;;  %v1423_v13 = vld [vmem:[#allocation6 + $0x380] ss:$8 sps:$4 sm:$0xff]  }
  0x62   :  { %1029 = vmatprep.mubr.bf16.mxu1 %v1094_v43 }
  0x63   :  { %957 = vmatpush1.bf16.msra.mxu0 %v1336_v14  ;;  %v1091_v14 = vcombine.low %v1523_v34, %v1525_v35 }
  0x64   :  { %1000 = vmatpush1.bf16.msra.mxu1 %v1339_v15  ;;  %958 = vmatprep.subr.bf16.mxu0 %v1344_v16  ;;  %v1093_v15 = vcombine.low %v1527_v36, %v1529_v37 }
  0x65   :  { %1001 = vmatprep.subr.bf16.mxu1 %v1347_v17 }
  0x67   :  { %959 = vmatpush1.bf16.msra.mxu0 %v1342_v18 }
  0x68   :  { %1002 = vmatpush1.bf16.msra.mxu1 %v1345_v19  ;;  %960 = vmatprep.subr.bf16.mxu0 %v1350_v20 }
  0x69   :  { %1003 = vmatprep.subr.bf16.mxu1 %v1353_v21 }
  0x6b   :  { %961 = vmatpush1.bf16.msra.mxu0 %v1348_v22 }
  0x6c   :  { %1004 = vmatpush1.bf16.msra.mxu1 %v1351_v23  ;;  %962 = vmatprep.subr.bf16.mxu0 %v1356_v24 }
  0x6d   :  { %1005 = vmatprep.subr.bf16.mxu1 %v1359_v25 }
  0x6f   :  { %963 = vmatpush1.bf16.msra.mxu0 %v1354_v26 }
  0x70   :  { %1006 = vmatpush1.bf16.msra.mxu1 %v1357_v27  ;;  %964 = vmatprep.subr.bf16.mxu0 %v1362_v28 }
  0x71   :  { %1007 = vmatprep.subr.bf16.mxu1 %v1365_v29 }
  0x73   :  { %965 = vmatpush1.bf16.msra.mxu0 %v1360_v30 }
  0x74   :  { %1008 = vmatpush1.bf16.msra.mxu1 %v1363_v31  ;;  %966 = vmatprep.subr.bf16.mxu0 %v1368_v32 }
  0x75   :  { %1009 = vmatprep.subr.bf16.mxu1 %v1371_v33 }
  0x77   :  { %967 = vmatpush1.bf16.msra.mxu0 %v1366_v38 }
  0x78   :  { %1010 = vmatpush1.bf16.msra.mxu1 %v1369_v39  ;;  %968 = vmatprep.subr.bf16.mxu0 %v1374_v41 }
  0x79   :  { %1011 = vmatprep.subr.bf16.mxu1 %v1377_v42 }
  0x7b   :  { %969 = vmatpush1.bf16.msra.mxu0 %v1372_v44 }
  0x7c   :  { %1012 = vmatpush1.bf16.msra.mxu1 %v1375_v45  ;;  %970 = vmatprep.subr.bf16.mxu0 %v1380_v46 }
  0x7d   :  { %1013 = vmatprep.subr.bf16.mxu1 %v1383_v47 }
  0x7f   :  { %971 = vmatpush2.bf16.msra.mxu0 %v1378_v48 }
  0x80   :  { %1014 = vmatpush2.bf16.msra.mxu1 %v1381_v49  ;;  %972 = vmatprep.subr.bf16.mxu0 %v1386_v50 }
  0x81   :  { %1015 = vmatprep.subr.bf16.mxu1 %v1389_v51 }
  0x83   :  { %973 = vmatpush2.bf16.msra.mxu0 %v1384_v52 }
  0x84   :  { %1016 = vmatpush2.bf16.msra.mxu1 %v1387_v53  ;;  %974 = vmatprep.subr.bf16.mxu0 %v1392_v54 }
  0x85   :  { %1017 = vmatprep.subr.bf16.mxu1 %v1395_v55 }
  0x87   :  { %975 = vmatpush2.bf16.msra.mxu0 %v1390_v56 }
  0x88   :  { %1018 = vmatpush2.bf16.msra.mxu1 %v1393_v57  ;;  %976 = vmatprep.subr.bf16.mxu0 %v1398_v58 }
  0x89   :  { %1019 = vmatprep.subr.bf16.mxu1 %v1401_v59 }
  0x8b   :  { %977 = vmatpush2.bf16.msra.mxu0 %v1396_v60 }
  0x8c   :  { %1020 = vmatpush2.bf16.msra.mxu1 %v1399_v61  ;;  %978 = vmatprep.subr.bf16.mxu0 %v1404_v62 }
  0x8d   :  { %1021 = vmatprep.subr.bf16.mxu1 %v1407_v63 }
  0x8f   :  { %979 = vmatpush2.bf16.msra.mxu0 %v1402_v0 }
  0x90   :  { %1022 = vmatpush2.bf16.msra.mxu1 %v1405_v1  ;;  %980 = vmatprep.subr.bf16.mxu0 %v1410_v2 }
  0x91   :  { %1023 = vmatprep.subr.bf16.mxu1 %v1413_v3 }
  0x93   :  { %981 = vmatpush2.bf16.msra.mxu0 %v1408_v4 }
  0x94   :  { %1024 = vmatpush2.bf16.msra.mxu1 %v1411_v5  ;;  %982 = vmatprep.subr.bf16.mxu0 %v1416_v6 }
  0x95   :  { %1025 = vmatprep.subr.bf16.mxu1 %v1419_v7 }
  0x97   :  { %983 = vmatpush2.bf16.msra.mxu0 %v1414_v8 }
  0x98   :  { %1026 = vmatpush2.bf16.msra.mxu1 %v1417_v9  ;;  %984 = vmatprep.subr.bf16.mxu0 %v1422_v10 }
  0x99   :  { %1027 = vmatprep.subr.bf16.mxu1 %v1425_v11 }
  0x9b   :  { %985 = vmatpush2.bf16.msra.mxu0 %v1420_v12 }
  0x9c   :  { %1028 = vmatpush2.bf16.msra.mxu1 %v1423_v13 }
  0x9e   :  { %987 = vmatmul.mubr.bf16.vlgmr.msra.gmra.mxu0 %v1091_v14 }
  0x9f   :  { %1030 = vmatmul.mubr.bf16.vlgmr.msra.gmra.mxu1 %v1093_v15 }
 0x11e   :  { %v902_v16 = vpop.f32.mrf.mxu0 }
 0x11f   :  { %v945_v17 = vpop.f32.mrf.mxu1 }
 0x120   :  { %v904_v18 = vpop.f32.mrf.mxu0  ;;  %v946_v24 = vadd.f32 %v945_v17, %v902_v16 }
 0x121   :  { %v947_v19 = vpop.f32.mrf.mxu1 }
 0x122   :  { %v906_v20 = vpop.f32.mrf.mxu0  ;;  %v948_v27 = vadd.f32 %v947_v19, %v904_v18 }
 0x123   :  { %v949_v21 = vpop.f32.mrf.mxu1 }
 0x124   :  { %v908_v22 = vpop.f32.mrf.mxu0  ;;  %v950_v31 = vadd.f32 %v949_v21, %v906_v20 }
 0x125   :  { %v951_v23 = vpop.f32.mrf.mxu1 }
 0x126   :  { %v952_v35 = vadd.f32 %v951_v23, %v908_v22 }
 0x15e   :  { %v988_v25 = vpop.f32.mrf.mxu0 }
 0x15f   :  { %v1031_v26 = vpop.f32.mrf.mxu1  ;;  %v989_v28 = vadd.f32 %v988_v25, %v946_v24 }
 0x160   :  { %v990_v29 = vpop.f32.mrf.mxu0 }
 0x161   :  { %v1033_v30 = vpop.f32.mrf.mxu1  ;;  %v991_v32 = vadd.f32 %v990_v29, %v948_v27  ;;  %v1032_v36 = vadd.f32 %v1031_v26, %v989_v28 }
 0x162   :  { %v992_v33 = vpop.f32.mrf.mxu0 }
 0x163   :  { %v1035_v34 = vpop.f32.mrf.mxu1  ;;  %v1034_v37 = vadd.f32 %v1033_v30, %v991_v32  ;;  %v993_v38 = vadd.f32 %v992_v33, %v950_v31 }
 0x164   :  { %v994_v39 = vpop.f32.mrf.mxu0 }
 0x165   :  { %v1225_v40 = vpack.c.bf16 %v1034_v37, %v1032_v36  ;;  %v995_v41 = vadd.f32 %v994_v39, %v952_v35  ;;  %v1037_v42 = vpop.f32.mrf.mxu1  ;;  %v1036_v43 = vadd.f32 %v1035_v34, %v993_v38 }
 0x167   :  { %1067 = vst [vmem:[#allocation8] sm:$0xff] %v1225_v40  ;;  %v1038_v44 = vadd.f32 %v1037_v42, %v995_v41 }
 0x169   :  { %v1226_v45 = vpack.c.bf16 %v1038_v44, %v1036_v43 }
 0x16b   :  { %1068 = vst [vmem:[#allocation8 + $0x8] sm:$0xff] %v1226_v45 }
 0x16c   :  { %1477 = shalt.err (!%p1474_p0)
}
 0x16d   :  { %1080 = dma.vmem_to_hbm [thread:$0]  %s1075_s1, 256, %s1547_s2, [#allocation5], %s1496_s19, %s1496_s19, %s1497_s20  }
 0x16e   :  { %1490 = dma.done.wait [#allocation5], 256  }
 0x16f   :  { %1491 = vsyncadd [#allocation5], 4294967040 }
 0x170   :  { %1084 = vsyncpa [#allocation4], 1 }
 0x171   :  { %1085 = vsyncpa [#allocation7], 1 }
 0x172   :  { %1086 = vsyncpa [#allocation5], 1 }

</bundles_post_ra>
